<compile_context>
chip_gen: v7x
topology: tpu7x:2x2x1
jax: 0.10.0
libtpu: 0.0.40
codegen_flags: <defaults>
</compile_context>

<pallas_src>
import functools

import jax
import jax.numpy as jnp
from jax.experimental import pallas as pl
from jax.experimental.pallas import tpu as pltpu


def _round_up(x, m):
    return (x + m - 1) // m * m


def _default_tiles():
    """MXU tile sizes: 256-wide on v6e/v7x, 128-wide on v5e."""
    try:
        kind = jax.devices()[0].device_kind.lower()
    except Exception:
        kind = ""
    if "v5 lite" in kind or "v5e" in kind or "v5litepod" in kind:
        return 128, 128, 512
    return 256, 256, 1024


_TM, _TN, _TK = _default_tiles()
_VMEM_LIMIT = 64 * 1024 * 1024
_NEG_LARGE = float(jnp.finfo(jnp.bfloat16).min)


# --------------------------------------------------------------------------
# Pallas kernels
# --------------------------------------------------------------------------

def _matmul_epilogue_kernel(a_ref, b_ref, scale_ref, bias_ref, *rest,
                            activation, has_residual):
    """Tiled bf16 matmul, f32 accumulator, fused scale/bias (+residual) (+ReLU)."""
    if has_residual:
        res_ref, o_ref, acc_ref = rest
    else:
        res_ref = None
        o_ref, acc_ref = rest

    @pl.when(pl.program_id(2) == 0)
    def _():
        acc_ref[...] = jnp.zeros_like(acc_ref)

    acc_ref[...] += jnp.dot(a_ref[...], b_ref[...],
                            preferred_element_type=jnp.float32)

    @pl.when(pl.program_id(2) == pl.num_programs(2) - 1)
    def _():
        out = acc_ref[...] * scale_ref[...] + bias_ref[...]
        if has_residual:
            out = out + res_ref[...].astype(jnp.float32)
        if activation == "relu":
            out = jnp.maximum(out, 0.0)
        o_ref[...] = out.astype(o_ref.dtype)


@functools.partial(jax.jit, static_argnames=("activation", "out_dtype"))
def matmul_scale_bias(a, b, scale, bias, residual=None, activation=None,
                      out_dtype=jnp.bfloat16):
    """out = act((a @ b) * scale + bias [+ residual]).

    a:(M,K) b:(K,N) scale,bias:(N,) residual:(M,N) or None.
    Operands are cast to bf16 (MXU), accumulation and epilogue math stay f32,
    output is stored as `out_dtype` (bf16 between layers).
    """
    M, K = a.shape
    _, N = b.shape

    tm = min(_TM, _round_up(M, 8))
    tn = min(_TN, _round_up(N, 128))
    tk = min(_TK, _round_up(K, 128))
    Mp, Kp, Np = _round_up(M, tm), _round_up(K, tk), _round_up(N, tn)

    a_p = a.astype(jnp.bfloat16)
    b_p = b.astype(jnp.bfloat16)
    if (Mp, Kp) != (M, K):
        a_p = jnp.pad(a_p, ((0, Mp - M), (0, Kp - K)))
    if (Kp, Np) != (K, N):
        b_p = jnp.pad(b_p, ((0, Kp - K), (0, Np - N)))

    s_p = scale.astype(jnp.float32).reshape(1, N)
    c_p = bias.astype(jnp.float32).reshape(1, N)
    if Np != N:
        s_p = jnp.pad(s_p, ((0, 0), (0, Np - N)))
        c_p = jnp.pad(c_p, ((0, 0), (0, Np - N)))

    in_specs = [
        pl.BlockSpec((tm, tk), lambda i, j, k: (i, k)),
        pl.BlockSpec((tk, tn), lambda i, j, k: (k, j)),
        pl.BlockSpec((1, tn), lambda i, j, k: (0, j)),
        pl.BlockSpec((1, tn), lambda i, j, k: (0, j)),
    ]
    operands = [a_p, b_p, s_p, c_p]

    has_residual = residual is not None
    if has_residual:
        r_p = residual.astype(jnp.bfloat16)
        if (Mp, Np) != (M, N):
            r_p = jnp.pad(r_p, ((0, Mp - M), (0, Np - N)))
        # Residual block index is independent of k -> fetched once per (i, j).
        in_specs.append(pl.BlockSpec((tm, tn), lambda i, j, k: (i, j)))
        operands.append(r_p)

    out = pl.pallas_call(
        functools.partial(_matmul_epilogue_kernel, activation=activation,
                          has_residual=has_residual),
        out_shape=jax.ShapeDtypeStruct((Mp, Np), out_dtype),
        grid_spec=pltpu.PrefetchScalarGridSpec(
            num_scalar_prefetch=0,
            grid=(Mp // tm, Np // tn, Kp // tk),
            in_specs=in_specs,
            out_specs=pl.BlockSpec((tm, tn), lambda i, j, k: (i, j)),
            scratch_shapes=[pltpu.VMEM((tm, tn), jnp.float32)],
        ),
        compiler_params=pltpu.CompilerParams(
            dimension_semantics=("parallel", "parallel", "arbitrary"),
            vmem_limit_bytes=_VMEM_LIMIT),
    )(*operands)

    if (Mp, Np) != (M, N):
        out = out[:M, :N]
    return out


def _window_max_kernel(p_ref, o_ref):
    o_ref[...] = jnp.max(p_ref[...].astype(jnp.float32), axis=1).astype(o_ref.dtype)


@jax.jit
def window_max(patches):
    """(M, KK, C) -> (M, C) max over the KK pooling-window axis (tiled over M)."""
    M, KK, C = patches.shape
    tm = min(512, _round_up(M, 8))
    Mp = _round_up(M, tm)
    p = patches
    if Mp != M:
        p = jnp.pad(p, ((0, Mp - M), (0, 0), (0, 0)), constant_values=_NEG_LARGE)
    out = pl.pallas_call(
        _window_max_kernel,
        out_shape=jax.ShapeDtypeStruct((Mp, C), patches.dtype),
        grid=(Mp // tm,),
        in_specs=[pl.BlockSpec((tm, KK, C), lambda i: (i, 0, 0))],
        out_specs=pl.BlockSpec((tm, C), lambda i: (i, 0)),
        compiler_params=pltpu.CompilerParams(
            dimension_semantics=("parallel",),
            vmem_limit_bytes=_VMEM_LIMIT),
    )(p)
    return out[:M] if Mp != M else out


def _gap_kernel(x_ref, o_ref, *, inv_hw):
    acc = jnp.sum(x_ref[...].astype(jnp.float32), axis=1)
    o_ref[...] = (acc * inv_hw).astype(o_ref.dtype)


@jax.jit
def global_avg_pool(x):
    """(B, HW, C) -> (B, C) mean over spatial axis (AdaptiveAvgPool2d((1,1)))."""
    B, HW, C = x.shape
    tb = B if B <= 8 else 8
    Bp = _round_up(B, tb)
    if C % 512 == 0:
        tc = 512
    elif C % 128 == 0:
        tc = 128
    else:
        tc = C
    xp = x
    if Bp != B:
        xp = jnp.pad(xp, ((0, Bp - B), (0, 0), (0, 0)))
    out = pl.pallas_call(
        functools.partial(_gap_kernel, inv_hw=1.0 / HW),
        out_shape=jax.ShapeDtypeStruct((Bp, C), jnp.float32),
        grid=(Bp // tb, C // tc),
        in_specs=[pl.BlockSpec((tb, HW, tc), lambda i, j: (i, 0, j))],
        out_specs=pl.BlockSpec((tb, tc), lambda i, j: (i, j)),
        compiler_params=pltpu.CompilerParams(
            dimension_semantics=("parallel", "parallel"),
            vmem_limit_bytes=_VMEM_LIMIT),
    )(xp)
    return out[:B] if Bp != B else out


# --------------------------------------------------------------------------
# Plain-JAX glue: im2col, conv+BN wrapper, ResNet-50 structure, MLP head
# --------------------------------------------------------------------------

def _im2col(x, kh, kw, stride, pad, pad_value=0.0):
    B, H, W, C = x.shape
    if pad > 0:
        xp = jnp.pad(x, ((0, 0), (pad, pad), (pad, pad), (0, 0)),
                     constant_values=pad_value)
    else:
        xp = x
    Ho = (H + 2 * pad - kh) // stride + 1
    Wo = (W + 2 * pad - kw) // stride + 1
    cols = []
    for i in range(kh):
        for j in range(kw):
            cols.append(xp[:, i:i + stride * (Ho - 1) + 1:stride,
                           j:j + stride * (Wo - 1) + 1:stride, :])
    patches = jnp.concatenate(cols, axis=-1)     # (B, Ho, Wo, kh*kw*C)
    return patches, (B, Ho, Wo)


def conv_bn(x, p, stride, pad, relu, residual=None):
    """conv (no bias) + folded inference BatchNorm + optional residual + ReLU."""
    w = p["w"]                                    # (kh, kw, Cin, Cout)
    kh, kw, cin, cout = w.shape
    if kh == 1 and kw == 1:
        # 1x1 conv: no im2col at all; stride handled by spatial subsampling.
        xs = x[:, ::stride, ::stride, :] if stride != 1 else x
        B, Ho, Wo, _ = xs.shape
        a = xs.reshape(B * Ho * Wo, cin)
    else:
        patches, (B, Ho, Wo) = _im2col(x, kh, kw, stride, pad)
        a = patches.reshape(B * Ho * Wo, kh * kw * cin)
    res2d = residual.reshape(B * Ho * Wo, cout) if residual is not None else None
    out = matmul_scale_bias(
        a, w.reshape(kh * kw * cin, cout),
        p["bn_scale"], p["bn_bias"],
        residual=res2d,
        activation="relu" if relu else None,
        out_dtype=jnp.bfloat16)
    return out.reshape(B, Ho, Wo, cout)


def max_pool_3x3_s2(x):
    B, H, W, C = x.shape
    patches, (B, Ho, Wo) = _im2col(x, 3, 3, 2, 1, pad_value=_NEG_LARGE)
    pooled = window_max(patches.reshape(B * Ho * Wo, 9, C))
    return pooled.reshape(B, Ho, Wo, C)


def bottleneck_forward(x, blk, stride):
    out = conv_bn(x, blk["conv1"], stride=1, pad=0, relu=True)
    out = conv_bn(out, blk["conv2"], stride=stride, pad=1, relu=True)
    if "downsample" in blk:
        identity = conv_bn(x, blk["downsample"], stride=stride, pad=0,
                           relu=False)
    else:
        identity = x
    # conv3 + BN + residual add + ReLU fused into a single matmul epilogue.
    out = conv_bn(out, blk["conv3"], stride=1, pad=0, relu=True,
                  residual=identity)
    return out


def resnet50_backbone_forward(x_nchw, params):
    x = jnp.transpose(x_nchw, (0, 2, 3, 1)).astype(jnp.bfloat16)  # NCHW -> NHWC
    # stem: 7x7/2 conv + BN + ReLU, then 3x3/2 max-pool
    x = conv_bn(x, params["stem"], stride=2, pad=3, relu=True)
    x = max_pool_3x3_s2(x)
    # four bottleneck stages (ResNet-50 strides are structural, kept static)
    for si, stage in enumerate(params["layers"]):
        for bi, blk in enumerate(stage):
            stride = 2 if (si > 0 and bi == 0) else 1
            x = bottleneck_forward(x, blk, stride)
    B, H, W, C = x.shape
    return global_avg_pool(x.reshape(B, H * W, C))   # (B, 2048) f32


def mlp_forward(x, mlp_params, activation="relu"):
    n = len(mlp_params)
    for i, lp in enumerate(mlp_params):
        last = (i == n - 1)
        ones = jnp.ones((lp["w"].shape[1],), jnp.float32)
        x = matmul_scale_bias(
            x, lp["w"], ones, lp["b"],
            activation=None if last else activation,   # no output_activation
            out_dtype=jnp.float32 if last else jnp.bfloat16)
    return x


@jax.jit
def custom_resnet_forward(x_nchw, backbone_params, mlp_params):
    feats = resnet50_backbone_forward(x_nchw, backbone_params)  # frozen backbone
    return mlp_forward(feats, mlp_params)                       # MLP head (model.fc)


# --------------------------------------------------------------------------
# Deterministic parameter construction (same shapes as resnet50 + MLP head)
# --------------------------------------------------------------------------

class ParamGen:
    def __init__(self, seed=42):
        self._key = jax.random.PRNGKey(seed)
        self._n = 0

    def draw(self, shape, scale=1.0):
        self._n += 1
        k = jax.random.fold_in(self._key, self._n)
        return scale * jax.random.normal(k, shape, jnp.float32)


def _make_conv_bn(pg, kh, kw, cin, cout):
    fan_in = kh * kw * cin
    return {
        "w": pg.draw((kh, kw, cin, cout), (2.0 / fan_in) ** 0.5).astype(jnp.bfloat16),
        # folded inference BN: scale = gamma/sqrt(var+eps), bias = beta - mean*scale
        "bn_scale": 1.0 + 0.05 * pg.draw((cout,)),
        "bn_bias": 0.05 * pg.draw((cout,)),
    }


def _make_linear(pg, cin, cout):
    return {"w": pg.draw((cin, cout), (1.0 / cin) ** 0.5).astype(jnp.bfloat16),
            "b": 0.01 * pg.draw((cout,))}


def make_resnet50_backbone_params(pg):
    base = 64
    params = {"stem": _make_conv_bn(pg, 7, 7, 3, base)}
    in_ch = base
    layers = []
    for stage, (blocks, mid) in enumerate(
            zip((3, 4, 6, 3), (base, base * 2, base * 4, base * 8))):
        stage_params = []
        out_ch = mid * 4
        for b in range(blocks):
            stride = 2 if (stage > 0 and b == 0) else 1
            blk = {
                "conv1": _make_conv_bn(pg, 1, 1, in_ch, mid),
                "conv2": _make_conv_bn(pg, 3, 3, mid, mid),
                "conv3": _make_conv_bn(pg, 1, 1, mid, out_ch),
            }
            if stride != 1 or in_ch != out_ch:
                blk["downsample"] = _make_conv_bn(pg, 1, 1, in_ch, out_ch)
            stage_params.append(blk)
            in_ch = out_ch
        layers.append(stage_params)
    params["layers"] = layers
    return params, in_ch          # in_ch == 2048 == model.fc.in_features


def make_mlp_params(pg, in_dim, hidden_dims, out_dim):
    dims = [in_dim] + list(hidden_dims) + [out_dim]
    return [_make_linear(pg, dims[i], dims[i + 1]) for i in range(len(dims) - 1)]


# --------------------------------------------------------------------------

if __name__ == "__main__":
    # Small deterministic example: CustomResNet('resnet50', fc_hidden=[64, 32],
    #                                           fc_out=8, freeze=True)
    B, C_in, H, W = 2, 3, 32, 32
    x = jax.random.normal(jax.random.PRNGKey(0), (B, C_in, H, W), jnp.float32)

    pg = ParamGen(seed=42)
    backbone_params, dim_resnet = make_resnet50_backbone_params(pg)
    mlp_params = make_mlp_params(pg, in_dim=dim_resnet, hidden_dims=[64, 32],
                                 out_dim=8)

    out = custom_resnet_forward(x, backbone_params, mlp_params)
    out = jax.block_until_ready(out)

    assert out.shape == (B, 8), out.shape
    assert bool(jnp.all(jnp.isfinite(out)))
    print("KERNEL_OK")
</pallas_src>

<mosaic_0001>
module attributes {stable_mosaic.version = 11 : i64} {
  func.func @_matmul_epilogue_kernel(%arg0: i32, %arg1: i32, %arg2: i32, %arg3: memref<256x256xbf16, #tpu.memory_space<vmem>>, %arg4: memref<256x128xbf16, #tpu.memory_space<vmem>>, %arg5: memref<1x128xf32, #tpu.memory_space<vmem>>, %arg6: memref<1x128xf32, #tpu.memory_space<vmem>>, %arg7: memref<256x128xbf16, #tpu.memory_space<vmem>>, %arg8: memref<256x128xf32, #tpu.memory_space<vmem>>) attributes {dimension_semantics = [#tpu.dimension_semantics<parallel>, #tpu.dimension_semantics<parallel>, #tpu.dimension_semantics<arbitrary>], iteration_bounds = array<i64: 2, 1, 1>, scalar_prefetch = 0 : i64, scratch_operands = 1 : i64, tpu.core_type = #tpu.core_type<tc>, window_params = [{transform_indices = @transform_0, window_bounds = array<i64: 256, 256>}, {transform_indices = @transform_1, window_bounds = array<i64: 256, 128>}, {transform_indices = @transform_2, window_bounds = array<i64: 1, 128>}, {transform_indices = @transform_3, window_bounds = array<i64: 1, 128>}, {transform_indices = @transform_4, window_bounds = array<i64: 256, 128>}]} {
    %c0_i32 = arith.constant 0 : i32
    %0 = arith.cmpi eq, %arg2, %c0_i32 : i32
    %1 = arith.extui %0 : i1 to i32
    %c0_i32_0 = arith.constant 0 : i32
    %2 = arith.cmpi ne, %1, %c0_i32_0 : i32
    scf.if %2 {
      %cst_10 = arith.constant 0.000000e+00 : f32
      %12 = vector.broadcast %cst_10 : f32 to vector<256x128xf32>
      %c0_11 = arith.constant 0 : index
      %c0_12 = arith.constant 0 : index
      %13 = vector.load %arg8[%c0_11, %c0_12] : memref<256x128xf32, #tpu.memory_space<vmem>>, vector<256x128xf32>
      tpu.vector_store %arg8[%c0_11, %c0_12], %12 {strides = array<i32>} : memref<256x128xf32, #tpu.memory_space<vmem>>, vector<256x128xf32>,
    } else {
    }
    %c0 = arith.constant 0 : index
    %c0_1 = arith.constant 0 : index
    %3 = vector.load %arg8[%c0, %c0_1] : memref<256x128xf32, #tpu.memory_space<vmem>>, vector<256x128xf32>
    %c0_2 = arith.constant 0 : index
    %c0_3 = arith.constant 0 : index
    %4 = vector.load %arg3[%c0_2, %c0_3] : memref<256x256xbf16, #tpu.memory_space<vmem>>, vector<256x256xbf16>
    %c0_4 = arith.constant 0 : index
    %c0_5 = arith.constant 0 : index
    %5 = vector.load %arg4[%c0_4, %c0_5] : memref<256x128xbf16, #tpu.memory_space<vmem>>, vector<256x128xbf16>
    %cst = arith.constant dense<0.000000e+00> : vector<256x128xf32>
    %6 = tpu.matmul %4, %5, %cst {dimension_numbers = #tpu.dot_dimension_numbers<[1], [0], [0], [1], [0, 0, 1, 1], [], []>} : vector<256x256xbf16>, vector<256x128xbf16>, vector<256x128xf32> -> vector<256x128xf32>
    %7 = arith.addf %3, %6 : vector<256x128xf32>
    %c0_6 = arith.constant 0 : index
    %c0_7 = arith.constant 0 : index
    %8 = vector.load %arg8[%c0_6, %c0_7] : memref<256x128xf32, #tpu.memory_space<vmem>>, vector<256x128xf32>
    tpu.vector_store %arg8[%c0_6, %c0_7], %7 {strides = array<i32>} : memref<256x128xf32, #tpu.memory_space<vmem>>, vector<256x128xf32>,
    %c0_i32_8 = arith.constant 0 : i32
    %9 = arith.cmpi eq, %arg2, %c0_i32_8 : i32
    %10 = arith.extui %9 : i1 to i32
    %c0_i32_9 = arith.constant 0 : i32
    %11 = arith.cmpi ne, %10, %c0_i32_9 : i32
    scf.if %11 {
      %c0_10 = arith.constant 0 : index
      %c0_11 = arith.constant 0 : index
      %12 = vector.load %arg8[%c0_10, %c0_11] : memref<256x128xf32, #tpu.memory_space<vmem>>, vector<256x128xf32>
      %c0_12 = arith.constant 0 : index
      %c0_13 = arith.constant 0 : index
      %13 = vector.load %arg5[%c0_12, %c0_13] : memref<1x128xf32, #tpu.memory_space<vmem>>, vector<1x128xf32>
      %14 = vector.broadcast %13 : vector<1x128xf32> to vector<256x128xf32>
      %15 = arith.mulf %12, %14 : vector<256x128xf32>
      %c0_14 = arith.constant 0 : index
      %c0_15 = arith.constant 0 : index
      %16 = vector.load %arg6[%c0_14, %c0_15] : memref<1x128xf32, #tpu.memory_space<vmem>>, vector<1x128xf32>
      %17 = vector.broadcast %16 : vector<1x128xf32> to vector<256x128xf32>
      %18 = arith.addf %15, %17 : vector<256x128xf32>
      %cst_16 = arith.constant 0.000000e+00 : f32
      %19 = vector.broadcast %cst_16 : f32 to vector<256x128xf32>
      %20 = arith.maximumf %18, %19 : vector<256x128xf32>
      %21 = arith.truncf %20 : vector<256x128xf32> to vector<256x128xbf16>
      %c0_17 = arith.constant 0 : index
      %c0_18 = arith.constant 0 : index
      %22 = vector.load %arg7[%c0_17, %c0_18] : memref<256x128xbf16, #tpu.memory_space<vmem>>, vector<256x128xbf16>
      tpu.vector_store %arg7[%c0_17, %c0_18], %21 {strides = array<i32>} : memref<256x128xbf16, #tpu.memory_space<vmem>>, vector<256x128xbf16>,
    } else {
    }
    return
  }
  func.func @transform_0(%arg0: i32, %arg1: i32, %arg2: i32) -> (i32, i32) {
    %c0_i32 = arith.constant 0 : i32
    return %arg0, %arg2 : i32, i32
  }
  func.func @transform_1(%arg0: i32, %arg1: i32, %arg2: i32) -> (i32, i32) {
    %c0_i32 = arith.constant 0 : i32
    return %arg2, %arg1 : i32, i32
  }
  func.func @transform_2(%arg0: i32, %arg1: i32, %arg2: i32) -> (i32, i32) {
    %c0_i32 = arith.constant 0 : i32
    %c0_i32_0 = arith.constant 0 : i32
    return %c0_i32, %arg1 : i32, i32
  }
  func.func @transform_3(%arg0: i32, %arg1: i32, %arg2: i32) -> (i32, i32) {
    %c0_i32 = arith.constant 0 : i32
    %c0_i32_0 = arith.constant 0 : i32
    return %c0_i32, %arg1 : i32, i32
  }
  func.func @transform_4(%arg0: i32, %arg1: i32, %arg2: i32) -> (i32, i32) {
    %c0_i32 = arith.constant 0 : i32
    return %arg0, %arg1 : i32, i32
  }
}

</mosaic_0001>

<bundles_post_ra>
// kernel: matmul_scale_bias.1
= control target key start
LH: loop header
LB: loop body
LE: loop exit
PB: predicated region body
PF: predicated region fallthrough
CT: control target
= control target key end

     0   :  { %9 = vsyncpa [#allocation4], 0  ;;  %s2541_s0 = inlined_call_operand.hbm [shape: bf16[512,256], index: 0, kind: input, shape index: {}]   ;;  %s2542_s1 = inlined_call_operand.hbm [shape: bf16[256,128], index: 1, kind: input, shape index: {}]   ;;  %s2543_s2 = inlined_call_operand.hbm [shape: f32[1,128], index: 2, kind: input, shape index: {}]   ;;  %s2544_s3 = inlined_call_operand.hbm [shape: f32[1,128], index: 3, kind: input, shape index: {}]   ;;  %s2545_s4 = inlined_call_operand.hbm [shape: bf16[512,128], index: 4, kind: output, shape index: {}]  }
   0x1   :  { %11 = vsyncpa [#allocation4 + $0x1], 0 }
   0x2   :  { %12 = vsyncpa [#allocation7], 0 }
   0x3   :  { %13 = vsyncpa [#allocation10], 0 }
   0x4   :  { %14 = vsyncpa [#allocation5], 0 }
   0x5   :  { %16 = vsyncpa [#allocation5 + $0x1], 0  ;;  %s2138_s15 = smov 0   ;;  %s2140_s16 = smov 0  }
   0x6   :  { %s2142_s17 = smov 0   ;;  %s2144_s18 = smov 0  }
   0x7   :  { %s2146_s19 = smov 0   ;;  %s2148_s20 = smov 0  }
   0x8 LB: > { %s1371_s21 = sadd.s32 4294967295, %s2100_s20   ;;  %s1372_s22 = sadd.s32 4294967294, %s2100_s20   ;;  %s2100_s20 = sphi %s2148_s20, %s22_s20   ;;  %s2096_s19 = sphi %s2146_s19, %s2572_s19   ;;  %s2092_s18 = sphi %s2144_s18, %s2571_s18   ;;  %s2088_s17 = sphi %s2142_s17, %s2570_s17   ;;  %s2084_s16 = sphi %s2140_s16, %s2569_s16   ;;  %s2080_s15 = sphi %s2138_s15, %s2568_s15  }
   0x9   : > { %p63_p0 = scmp.ne.s32.totalorder %s2084_s16, %s2080_s15  ;;  %p2172_p1 = scmp.eq.s32.totalorder %s1371_s21, 0 }
   0xa   : > { %p2176_p2 = scmp.eq.s32.totalorder %s1371_s21, 1  ;;  %p175_p3 = scmp.eq.s32.totalorder %s1372_s22, 1 }
   0xb   : > { %s2551_s23 = scalar_select %p2172_p1, 1, 0 }
   0xc   : > { %s2552_s24 = scalar_select %p2176_p2, 1, 0 }
   0xd   : > { %p2182_p4 = por %p2172_p1, %p63_p0  ;;  %p1373_p5 = scmp.ge.s32.totalorder %s2100_s20, 1 }
   0xe   : > { %p2187_p6 = por %p175_p3, %p63_p0  ;;  %p182_p7 = scmp.lt.s32.totalorder %s2100_s20, 3 }
   0xf   : > { %s2553_s25 = scalar_select %p2182_p4, 1, 0 }
  0x10   : > { %s2554_s26 = scalar_select %p2187_p6, 1, 0 }
  0x11   : > { %p2192_p8 = pnand %p1373_p5, %p182_p7  ;;  %s2102_s28 = smov [#allocation6]  }
  0x12   : > { %2555 = sst [smem:[#allocation16_spill]] %s2554_s26  ;;  %s198_s29 = sshll.u32 %s2102_s28, 4  ;;  %s2196_s29 = int_to_ptr.vmem [resolvable:$true] %s198_s29 }
  0x13   : > { %s2556_s27 = scalar_select %p2192_p8, 1, 0 }
  0x14   : > { %p1749_p9 = pneg %p2192_p8  ;;  %s2103_s5 = smov [#allocation8]  }
  0x15   : > { %s214_s6 = sshll.u32 %s2103_s5, 4  ;;  %s2104_s7 = smov [#allocation9]   ;;  %s2207_s6 = int_to_ptr.vmem [resolvable:$true] %s214_s6 }
  0x16   : > { %p2203_p11 = pnand %p1749_p9, %p2172_p1  ;;  %s2209_s8 = sshll.u32 %s2104_s7, 4  ;;  %s228_s8 = int_to_ptr.vmem [resolvable:$true] %s2209_s8 }
  0x17   : > { %s1896_s11 = scalar_lea.hbm %s2542_s1, 2048 }
  0x18   : > { %p1897_p12 = scmp.ne.s32.totalorder %s2542_s1, %s1896_s11  ;;  %p2219_p13 = pneg %p2203_p11 }
  0x19   : > { %p1903_p5 = scmp.lt.u32.totalorder %s1896_s11, %s2542_s1 }
  0x1a   : > { %p1899_p0 = pnand %p2219_p13, %p1897_p12 }
  0x1c   : > { %p1900_p3 = pneg %p1899_p0 }
  0x1e   : > { %p1905_p7 = pnand %p1903_p5, %p1900_p3 }
  0x20   : > { %1908 = shalt.err (!%p1905_p7)
}
  0x21   : > { %s1909_s28 = scalar_lea.vmem %s2196_s29, 2048  ;;  %p1917_p1 = scmp.lt.s32.totalorder %s2196_s29, %s2196_s29 }
  0x22   : > { %p1910_p9 = scmp.ne.s32.totalorder %s2196_s29, %s1909_s28  ;;  %p1918_p4 = scmp.lt.s32.totalorder %s1909_s28, %s1909_s28 }
  0x24   : > { %p1912_p10 = pnand %p1910_p9, %p2219_p13  ;;  %p1919_p12 = por %p1918_p4, %p1917_p1 }
  0x26   : > { %p1913_p6 = pneg %p1912_p10 }
  0x28   : > { %p1920_p0 = pnand %p1919_p12, %p1913_p6 }
  0x2a   : > { %1923 = shalt.err (!%p1920_p0)
}
  0x2b   : > { %s2105_s5 = smov 64   ;;  %s2106_s7 = smov 4  }
  0x2c   : > { %1752 = dma.hbm_to_vmem [thread:$0]  (!%p2203_p11), %s2542_s1, 2048, %s2196_s29, [#allocation7], %s2105_s5, %s2105_s5, %s2106_s7  }
  0x2d   : > { %s1924_s13 = scalar_lea.hbm %s2543_s2, 16 }
  0x2e   : > { %p1925_p1 = scmp.ne.s32.totalorder %s2543_s2, %s1924_s13  ;;  %p1931_p10 = scmp.lt.u32.totalorder %s1924_s13, %s2543_s2 }
  0x30   : > { %p1927_p4 = pnand %p1925_p1, %p2219_p13 }
  0x32   : > { %p1928_p6 = pneg %p1927_p4 }
  0x34   : > { %p1933_p3 = pnand %p1931_p10, %p1928_p6 }
  0x36   : > { %1936 = shalt.err (!%p1933_p3)
}
  0x37   : > { %s1937_s29 = scalar_lea.vmem %s2207_s6, 16  ;;  %s1944_s5 = scalar_lea.vmem %s2207_s6, 32 }
  0x38   : > { %p1938_p5 = scmp.ne.s32.totalorder %s2207_s6, %s1937_s29  ;;  %p1945_p12 = scmp.lt.s32.totalorder %s2207_s6, %s2207_s6 }
  0x39   : > { %p1946_p0 = scmp.lt.s32.totalorder %s1944_s5, %s1937_s29 }
  0x3a   : > { %p1940_p7 = pnand %p1938_p5, %p2219_p13 }
  0x3b   : > { %p1947_p1 = por %p1946_p0, %p1945_p12 }
  0x3c   : > { %p1941_p9 = pneg %p1940_p7 }
  0x3e   : > { %p1948_p4 = pnand %p1947_p1, %p1941_p9 }
  0x40   : > { %1951 = shalt.err (!%p1948_p4)
}
  0x41   : > { %1755 = dma.hbm_to_vmem [thread:$0]  (!%p2203_p11), %s2543_s2, 16, %s2207_s6, [#allocation7]  }
  0x42   : > { %s1952_s11 = scalar_lea.hbm %s2544_s3, 16 }
  0x43   : > { %p1953_p6 = scmp.ne.s32.totalorder %s2544_s3, %s1952_s11  ;;  %p1959_p5 = scmp.lt.u32.totalorder %s1952_s11, %s2544_s3 }
  0x45   : > { %p1955_p10 = pnand %p1953_p6, %p2219_p13 }
  0x47   : > { %p1956_p3 = pneg %p1955_p10 }
  0x49   : > { %p1961_p7 = pnand %p1959_p5, %p1956_p3 }
  0x4b   : > { %1964 = shalt.err (!%p1961_p7)
}
  0x4c   : > { %s1965_s28 = scalar_lea.vmem %s228_s8, 16  ;;  %s1972_s6 = scalar_lea.vmem %s228_s8, 32 }
  0x4d   : > { %p1966_p9 = scmp.ne.s32.totalorder %s228_s8, %s1965_s28  ;;  %p1973_p1 = scmp.lt.s32.totalorder %s228_s8, %s228_s8 }
  0x4e   : > { %p1974_p4 = scmp.lt.s32.totalorder %s1972_s6, %s1965_s28 }
  0x4f   : > { %p1968_p12 = pnand %p1966_p9, %p2219_p13 }
  0x50   : > { %p1975_p8 = por %p1974_p4, %p1973_p1 }
  0x51   : > { %p1969_p0 = pneg %p1968_p12 }
  0x53   : > { %p1976_p2 = pnand %p1975_p8, %p1969_p0 }
  0x55   : > { %1979 = shalt.err (!%p1976_p2)
}
  0x56   : > { %1758 = dma.hbm_to_vmem [thread:$0]  (!%p2203_p11), %s2544_s3, 16, %s228_s8, [#allocation10]  }
  0x57   : > { %s50_s14 = sadd.s32 1, %s2088_s17  ;;  %s41_s26 = sadd.s32 1, %s2096_s19 }
  0x58   : > { %p57_p2 = scmp.ne.s32.totalorder %s2088_s17, %s2084_s16  ;;  %p43_p8 = scmp.ge.s32.totalorder %s41_s26, 2 }
  0x59   : > { %p58_p13 = scmp.eq.s32.totalorder %s2100_s20, 0  ;;  %p2559_p6 = scmp.ne.s32.totalorder %s2552_s24, 0 }
  0x5a   : > { %p1770_p3 = scmp.lt.s32.totalorder %s2100_s20, 2  ;;  %s2574_s26 = smov (%p43_p8, %s41_s26), 0 }
  0x5b   : > { %p2290_p10 = por %p2559_p6, %p57_p2  ;;  %p59_p5 = por %p58_p13, %p57_p2 }
  0x5c   : > { %s238_s7 = sand.u32 1, %s2088_s17   ;;  %s45_s9 = ssub.s32 %s2096_s19, %s2574_s26 }
  0x5d   : > { %p48_p7 = scmp.eq.s32.totalorder %s45_s9, 0  ;;  %s1378_s8 = sshll.u32 %s238_s7, 8 }
  0x5e   : > { %s1476_s10 = sshll.u32 %s2096_s19, 12  ;;  %s242_s21 = scalar_lea.vmem [#allocation3], %s1378_s8 }
  0x5f   : > { %s2302_s11 = scalar_select %p48_p7, %s2088_s17, %s50_s14  }
  0x60   : > { %s2307_s24 = scalar_lea.hbm %s2541_s0, %s1476_s10  ;;  %s252_s22 = sshll.u32 %s242_s21, 4  ;;  %s2309_s22 = int_to_ptr.vmem [resolvable:$true] %s252_s22 }
  0x61   : > { %p2313_p11 = pnand %p1770_p3, %p59_p5  ;;  %s2317_s6 = scalar_lea.sflag [#allocation4], %s238_s7 }
  0x62   : > { %s1980_s29 = scalar_lea.hbm %s2307_s24, 4096  ;;  %s1985_s9 = scalar_lea.hbm %s2541_s0, 8192 }
  0x63   : > { %p1981_p9 = scmp.ne.s32.totalorder %s2307_s24, %s1980_s29  ;;  %p1982_p12 = pneg %p2313_p11 }
  0x64   : > { %p1986_p4 = scmp.lt.u32.totalorder %s2307_s24, %s2541_s0  ;;  %p1987_p2 = scmp.lt.u32.totalorder %s1985_s9, %s1980_s29 }
  0x65   : > { %p1983_p0 = pnand %p1982_p12, %p1981_p9  ;;  %p1989_p13 = scmp.lt.u32.totalorder %s1980_s29, %s2307_s24 }
  0x66   : > { %p1988_p8 = por %p1987_p2, %p1986_p4 }
  0x67   : > { %p1984_p1 = pneg %p1983_p0 }
  0x68   : > { %p1990_p6 = por %p1989_p13, %p1988_p8 }
  0x6a   : > { %p1991_p3 = pnand %p1990_p6, %p1984_p1 }
  0x6c   : > { %1994 = shalt.err (!%p1991_p3)
}
  0x6d   : > { %s1995_s7 = scalar_lea.vmem %s2309_s22, 4096  ;;  %s2107_s12 = smov [#allocation3]  }
  0x6e   : > { %p1996_p5 = scmp.ne.s32.totalorder %s2309_s22, %s1995_s7  ;;  %s2000_s13 = sshll.u32 %s2107_s12, 4  ;;  %s2001_s13 = int_to_ptr.vmem [resolvable:$false] %s2000_s13 }
  0x6f   : > { %s2002_s21 = scalar_lea.vmem %s2001_s13, 8192  ;;  %p2003_p0 = scmp.lt.s32.totalorder %s2309_s22, %s2001_s13 }
  0x70   : > { %p1998_p7 = pnand %p1996_p5, %p1982_p12  ;;  %p2004_p4 = scmp.lt.s32.totalorder %s2002_s21, %s1995_s7 }
  0x72   : > { %p1999_p9 = pneg %p1998_p7  ;;  %p2005_p2 = por %p2004_p4, %p2003_p0 }
  0x74   : > { %p2006_p8 = pnand %p2005_p2, %p1999_p9 }
  0x76   : > { %2009 = shalt.err (!%p2006_p8)
}
  0x77   : > { %s2108_s29 = smov 128   ;;  %s2109_s5 = smov 8  }
  0x78   : > { %1762 = dma.hbm_to_vmem [thread:$0]  (!%p2313_p11), %s2307_s24, 4096, %s2309_s22, %s2317_s6, %s2108_s29, %s2108_s29, %s2109_s5  }
  0x79   : > { %p2562_p12 = scmp.ne.s32.totalorder %s2556_s27, 0 }
  0x7a   : > { %s2348_s14 = sand.u32 (!%p2562_p12), 1, %s2084_s16   ;;  %p2563_p1 = scmp.ne.s32.totalorder (!%p2562_p12), %s2553_s25, 0 }
  0x7b   : > { %264 = sbr.rel (%p2562_p12) target bundleno = 466 (0x1d2), region = 36  ;;  %s1383_s9 = sshll.u32 (!%p2562_p12), %s2348_s14, 8 }
  0x7c   : > { %s267_s8 = scalar_lea.sflag (!%p2562_p12), [#allocation4], %s2348_s14  ;;  %s2352_s10 = scalar_lea.vmem (!%p2562_p12), [#allocation3], %s1383_s9 }
  0x82   : > { %2063 = dma.done.wait (%p2563_p1), %s267_s8, 4096  }
  0x83   : > { %2065 = vsyncadd (%p2563_p1), %s267_s8, 4294963200  ;;  %p2564_p11 = scmp.ne.s32.totalorder %s2551_s23, 0 }
  0x85   : > { %2067 = dma.done.wait (%p2564_p11), [#allocation7], 2064  }
  0x86   : > { %2069 = vsyncadd (%p2564_p11), [#allocation7], 4294965232 }
  0x87   : > { %2071 = dma.done.wait (%p2564_p11), [#allocation10], 16  }
  0x88   : > { %2073 = vsyncadd (%p2564_p11), [#allocation10], 4294967280  ;;  %v1832_v0 = vld [vmem:[#allocation6 + $0x40] sm:$0xff]   ;;  %v1834_v2 = vld [vmem:[#allocation6 + $0x48] sm:$0xff]   ;;  %s1387_s23 = sshll.u32 %s2348_s14, 7  ;;  %s1509_s27 = sshll.u32 %s2092_s18, 11 }
  0x89   : > { %v1833_v1 = vld [vmem:[#allocation6] sm:$0xff]   ;;  %1605 = vmatprep.subr.bf16.mxu0 %v1832_v0  ;;  %1717 = vmatprep.subr.bf16.mxu1 %v1832_v0  ;;  %v1835_v3 = vld [vmem:[#allocation6 + $0x8] sm:$0xff]   ;;  %v1836_v4 = vld [vmem:[#allocation6 + $0x50] sm:$0xff]   ;;  %s2413_s25 = scalar_lea.vmem [#allocation11], %s1387_s23  ;;  %s2488_s6 = scalar_lea.hbm %s2545_s4, %s1509_s27 }
  0x8a   : > { %1606 = vmatpush3.bf16.msra.mxu0 %v1833_v1  ;;  %1725 = vmatpush3.bf16.msra.mxu1 %v1833_v1  ;;  %v1837_v5 = vld [vmem:[#allocation6 + $0x10] sm:$0xff]   ;;  %v1838_v6 = vld [vmem:[#allocation6 + $0x58] sm:$0xff]   ;;  %v1840_v8 = vld [vmem:[#allocation6 + $0x60] sm:$0xff]   ;;  %s1245_s24 = sshll.u32 %s2413_s25, 4  ;;  %s1231_s18 = scalar_lea.sflag [#allocation5], %s2348_s14  ;;  %s2490_s24 = int_to_ptr.vmem [resolvable:$true] %s1245_s24 }
  0x8b   : > { %1607 = vmatprep.subr.bf16.mxu0 %v1834_v2  ;;  %1718 = vmatprep.subr.bf16.mxu1 %v1834_v2  ;;  %v1839_v7 = vld [vmem:[#allocation6 + $0x18] sm:$0xff]   ;;  %v1841_v9 = vld [vmem:[#allocation6 + $0x20] sm:$0xff]   ;;  %v1842_v10 = vld [vmem:[#allocation6 + $0x68] sm:$0xff]   ;;  %s2010_s7 = scalar_lea.vmem %s2490_s24, 2048  ;;  %s2110_s12 = smov [#allocation11]  }
  0x8c   : > { %v1850_v11 = vld [vmem:[%s2352_s10 + $0x4] ss:$8 sps:$4 sm:$0xff]   ;;  %v1844_v14 = vld [vmem:[#allocation6 + $0x70] sm:$0xff]   ;;  %v1846_v16 = vld [vmem:[#allocation6 + $0x78] sm:$0xff]   ;;  %p2011_p13 = scmp.ne.s32.totalorder %s2490_s24, %s2010_s7  ;;  %s2014_s13 = sshll.u32 %s2110_s12, 4  ;;  %s2015_s13 = int_to_ptr.vmem [resolvable:$false] %s2014_s13 }
  0x8d   : > { %v1853_v12 = vld [vmem:[%s2352_s10 + $0x84] ss:$8 sps:$4 sm:$0xff]   ;;  %732 = vmatprep.mubr.bf16.mxu0 %v1850_v11  ;;  %v1845_v15 = vld [vmem:[#allocation6 + $0x30] sm:$0xff]   ;;  %v1847_v17 = vld [vmem:[#allocation6 + $0x38] sm:$0xff]   ;;  %s2016_s21 = scalar_lea.vmem %s2015_s13, 4096  ;;  %p2017_p5 = scmp.lt.s32.totalorder %s2490_s24, %s2015_s13 }
  0x8e   : > { %1608 = vmatpush3.bf16.msra.mxu0 %v1835_v3  ;;  %1726 = vmatpush3.bf16.msra.mxu1 %v1835_v3  ;;  %v1843_v13 = vld [vmem:[#allocation6 + $0x28] sm:$0xff]   ;;  %v1854_v20 = vld [vmem:[%s2352_s10 + $0x14] ss:$8 sps:$4 sm:$0xff]   ;;  %v1858_v22 = vld [vmem:[%s2352_s10 + $0x10] ss:$8 sps:$4 sm:$0xff]   ;;  %p2012_p6 = pnand %p2011_p13, %p2290_p10  ;;  %p2018_p7 = scmp.lt.s32.totalorder %s2016_s21, %s2010_s7 }
  0x8f   : > { %1609 = vmatprep.subr.bf16.mxu0 %v1836_v4  ;;  %1719 = vmatprep.subr.bf16.mxu1 %v1836_v4  ;;  %v1848_v18 = vld [vmem:[%s2352_s10] ss:$8 sps:$4 sm:$0xff]   ;;  %v1856_v21 = vld [vmem:[%s2352_s10 + $0x94] ss:$8 sps:$4 sm:$0xff]   ;;  %v1859_v23 = vld [vmem:[%s2352_s10 + $0x90] ss:$8 sps:$4 sm:$0xff]  }
  0x90   : > { %796 = vmatprep.mubr.bf16.mxu1 %v1853_v12  ;;  %v1851_v19 = vld [vmem:[%s2352_s10 + $0x80] ss:$8 sps:$4 sm:$0xff]   ;;  %v1860_v24 = vld [vmem:[%s2352_s10 + $0x24] ss:$8 sps:$4 sm:$0xff]   ;;  %v1866_v28 = vld [vmem:[%s2352_s10 + $0x34] ss:$8 sps:$4 sm:$0xff]   ;;  %p2013_p3 = pneg %p2012_p6  ;;  %p2019_p9 = por %p2018_p7, %p2017_p5 }
  0x91   : > { %v1862_v25 = vld [vmem:[%s2352_s10 + $0xa4] ss:$8 sps:$4 sm:$0xff]   ;;  %v1864_v26 = vld [vmem:[%s2352_s10 + $0x20] ss:$8 sps:$4 sm:$0xff]   ;;  %v1868_v29 = vld [vmem:[%s2352_s10 + $0xb4] ss:$8 sps:$4 sm:$0xff]  }
  0x92   : > { %1610 = vmatpush3.bf16.msra.mxu0 %v1837_v5  ;;  %1727 = vmatpush3.bf16.msra.mxu1 %v1837_v5  ;;  %v1865_v27 = vld [vmem:[%s2352_s10 + $0xa0] ss:$8 sps:$4 sm:$0xff]   ;;  %v1870_v30 = vld [vmem:[%s2352_s10 + $0x30] ss:$8 sps:$4 sm:$0xff]   ;;  %v1872_v32 = vld [vmem:[%s2352_s10 + $0x44] ss:$8 sps:$4 sm:$0xff]   ;;  %p2020_p0 = pnand %p2019_p9, %p2013_p3 }
  0x93   : > { %1611 = vmatprep.subr.bf16.mxu0 %v1838_v6  ;;  %1720 = vmatprep.subr.bf16.mxu1 %v1838_v6  ;;  %v1871_v31 = vld [vmem:[%s2352_s10 + $0xb0] ss:$8 sps:$4 sm:$0xff]   ;;  %v1874_v33 = vld [vmem:[%s2352_s10 + $0xc4] ss:$8 sps:$4 sm:$0xff]   ;;  %v1876_v34 = vld [vmem:[%s2352_s10 + $0x40] ss:$8 sps:$4 sm:$0xff]  }
  0x94   : > { %v1877_v35 = vld [vmem:[%s2352_s10 + $0xc0] ss:$8 sps:$4 sm:$0xff]   ;;  %v1878_v36 = vld [vmem:[%s2352_s10 + $0x54] ss:$8 sps:$4 sm:$0xff]   ;;  %v1882_v38 = vld [vmem:[%s2352_s10 + $0x50] ss:$8 sps:$4 sm:$0xff]  }
  0x95   : > { %v1880_v37 = vld [vmem:[%s2352_s10 + $0xd4] ss:$8 sps:$4 sm:$0xff]   ;;  %v1883_v39 = vld [vmem:[%s2352_s10 + $0xd0] ss:$8 sps:$4 sm:$0xff]   ;;  %v1884_v40 = vld [vmem:[%s2352_s10 + $0x64] ss:$8 sps:$4 sm:$0xff]  }
  0x96   : > { %1612 = vmatpush3.bf16.msra.mxu0 %v1839_v7  ;;  %1728 = vmatpush3.bf16.msra.mxu1 %v1839_v7  ;;  %v1886_v41 = vld [vmem:[%s2352_s10 + $0xe4] ss:$8 sps:$4 sm:$0xff]   ;;  %v1888_v42 = vld [vmem:[%s2352_s10 + $0x60] ss:$8 sps:$4 sm:$0xff]   ;;  %v1890_v44 = vld [vmem:[%s2352_s10 + $0x74] ss:$8 sps:$4 sm:$0xff]  }
  0x97   : > { %1613 = vmatprep.subr.bf16.mxu0 %v1840_v8  ;;  %1721 = vmatprep.subr.bf16.mxu1 %v1840_v8  ;;  %v1889_v43 = vld [vmem:[%s2352_s10 + $0xe0] ss:$8 sps:$4 sm:$0xff]   ;;  %v1892_v45 = vld [vmem:[%s2352_s10 + $0xf4] ss:$8 sps:$4 sm:$0xff]   ;;  %v1894_v46 = vld [vmem:[%s2352_s10 + $0x70] ss:$8 sps:$4 sm:$0xff]  }
  0x98   : > { %v1895_v47 = vld [vmem:[%s2352_s10 + $0xf0] ss:$8 sps:$4 sm:$0xff]   ;;  %v2398_v51 = vld [vmem:[#allocation8] ss:$0 sm:$0xff]  ;;  %v2400_v57 = vld [vmem:[#allocation9] ss:$0 sm:$0xff] }
  0x9a   : > { %1614 = vmatpush3.bf16.msra.mxu0 %v1841_v9  ;;  %1729 = vmatpush3.bf16.msra.mxu1 %v1841_v9 }
  0x9b   : > { %1615 = vmatprep.subr.bf16.mxu0 %v1842_v10  ;;  %1722 = vmatprep.subr.bf16.mxu1 %v1842_v10 }
  0x9e   : > { %1616 = vmatpush3.bf16.msra.mxu0 %v1843_v13  ;;  %1730 = vmatpush3.bf16.msra.mxu1 %v1843_v13 }
  0x9f   : > { %1617 = vmatprep.subr.bf16.mxu0 %v1844_v14  ;;  %1723 = vmatprep.subr.bf16.mxu1 %v1844_v14 }
  0xa2   : > { %1618 = vmatpush3.bf16.msra.mxu0 %v1845_v15  ;;  %1731 = vmatpush3.bf16.msra.mxu1 %v1845_v15 }
  0xa3   : > { %1619 = vmatprep.subr.bf16.mxu0 %v1846_v16  ;;  %1724 = vmatprep.subr.bf16.mxu1 %v1846_v16 }
  0xa6   : > { %1620 = vmatpush3.bf16.msra.mxu0 %v1847_v17  ;;  %1732 = vmatpush3.bf16.msra.mxu1 %v1847_v17 }
  0xa9   : > { %733 = vmatmul.mubr.bf16.vlgmr.msra.gmra.mrb[0].mxu0 %v1848_v18  ;;  %797 = vmatmul.mubr.bf16.vlgmr.msra.gmra.mrb[0].mxu1 %v1851_v19 }
  0xaa   : > { %740 = vmatprep.mubr.bf16.mxu0 %v1854_v20  ;;  %804 = vmatprep.mubr.bf16.mxu1 %v1856_v21 }
  0xb1   : > { %741 = vmatmul.mubr.bf16.gmra.mrb[4].mxu0 %v1858_v22  ;;  %805 = vmatmul.mubr.bf16.gmra.mrb[4].mxu1 %v1859_v23 }
  0xb2   : > { %748 = vmatprep.mubr.bf16.mxu0 %v1860_v24  ;;  %812 = vmatprep.mubr.bf16.mxu1 %v1862_v25 }
  0xb9   : > { %749 = vmatmul.mubr.bf16.gmra.mrb[8].mxu0 %v1864_v26  ;;  %813 = vmatmul.mubr.bf16.gmra.mrb[8].mxu1 %v1865_v27 }
  0xba   : > { %756 = vmatprep.mubr.bf16.mxu0 %v1866_v28  ;;  %820 = vmatprep.mubr.bf16.mxu1 %v1868_v29 }
  0xc1   : > { %757 = vmatmul.mubr.bf16.gmra.mrb[12].mxu0 %v1870_v30  ;;  %821 = vmatmul.mubr.bf16.gmra.mrb[12].mxu1 %v1871_v31 }
  0xc2   : > { %764 = vmatprep.mubr.bf16.mxu0 %v1872_v32  ;;  %828 = vmatprep.mubr.bf16.mxu1 %v1874_v33 }
  0xc9   : > { %765 = vmatmul.mubr.bf16.gmra.mrb[16].mxu0 %v1876_v34  ;;  %829 = vmatmul.mubr.bf16.gmra.mrb[16].mxu1 %v1877_v35 }
  0xca   : > { %772 = vmatprep.mubr.bf16.mxu0 %v1878_v36  ;;  %836 = vmatprep.mubr.bf16.mxu1 %v1880_v37 }
  0xd1   : > { %773 = vmatmul.mubr.bf16.gmra.mrb[20].mxu0 %v1882_v38  ;;  %837 = vmatmul.mubr.bf16.gmra.mrb[20].mxu1 %v1883_v39 }
  0xd2   : > { %780 = vmatprep.mubr.bf16.mxu0 %v1884_v40  ;;  %844 = vmatprep.mubr.bf16.mxu1 %v1886_v41 }
  0xd9   : > { %781 = vmatmul.mubr.bf16.gmra.mrb[24].mxu0 %v1888_v42  ;;  %845 = vmatmul.mubr.bf16.gmra.mrb[24].mxu1 %v1889_v43 }
  0xda   : > { %788 = vmatprep.mubr.bf16.mxu0 %v1890_v44  ;;  %852 = vmatprep.mubr.bf16.mxu1 %v1892_v45 }
  0xe1   : > { %789 = vmatmul.mubr.bf16.gmra.mrb[28].mxu0 %v1894_v46  ;;  %853 = vmatmul.mubr.bf16.gmra.mrb[28].mxu1 %v1895_v47 }
 0x17c   : > { %v1621_v48 = vpop.f32.mrb[0].mxu0  ;;  %v1669_v49 = vpop.f32.mrb[0].mxu1 }
 0x17d   : > { %v1622_v50 = vpop.f32.mrb[1].mxu0  ;;  %v1670_v52 = vpop.f32.mrb[1].mxu1 }
 0x17e   : > { %v1623_v53 = vadd.f32 %v1622_v50, %v1621_v48  ;;  %v1671_v54 = vadd.f32 %v1670_v52, %v1669_v49  ;;  %v1624_v55 = vpop.f32.mrb[2].mxu0  ;;  %v1672_v56 = vpop.f32.mrb[2].mxu1 }
 0x17f   : > { %v1625_v58 = vpop.f32.mrb[3].mxu0  ;;  %v1673_v59 = vpop.f32.mrb[3].mxu1 }
 0x180   : > { %v967_v60 = vmul.f32 %v1623_v53, %v2398_v51  ;;  %v983_v61 = vmul.f32 %v1671_v54, %v2398_v51  ;;  %v1626_v62 = vadd.f32 %v1625_v58, %v1624_v55  ;;  %v1674_v63 = vadd.f32 %v1673_v59, %v1672_v56 }
 0x182   : > { %v1006_v0 = vadd.f32 %v2400_v57, %v967_v60  ;;  %v1022_v1 = vadd.f32 %v2400_v57, %v983_v61  ;;  %v968_v2 = vmul.f32 %v1626_v62, %v2398_v51  ;;  %v984_v3 = vmul.f32 %v1674_v63, %v2398_v51 }
 0x184   : > { %v1007_v4 = vadd.f32 %v2400_v57, %v968_v2  ;;  %v1023_v5 = vadd.f32 %v2400_v57, %v984_v3  ;;  %v1627_v6 = vpop.f32.mrb[4].mxu0  ;;  %v1675_v7 = vpop.f32.mrb[4].mxu1  ;;  %v1038_v8 = vmax.f32 %v1006_v0, 0.0  ;;  %v1054_v9 = vmax.f32 %v1022_v1, 0.0 }
 0x185   : > { %v1628_v10 = vpop.f32.mrb[5].mxu0  ;;  %v1676_v11 = vpop.f32.mrb[5].mxu1 }
 0x186   : > { %v1039_v12 = vmax.f32 %v1007_v4, 0.0  ;;  %v1055_v13 = vmax.f32 %v1023_v5, 0.0  ;;  %v1629_v14 = vadd.f32 %v1628_v10, %v1627_v6  ;;  %v1677_v15 = vadd.f32 %v1676_v11, %v1675_v7  ;;  %v1630_v16 = vpop.f32.mrb[6].mxu0  ;;  %v1678_v17 = vpop.f32.mrb[6].mxu1 }
 0x187   : > { %v1631_v18 = vpop.f32.mrb[7].mxu0  ;;  %v1679_v19 = vpop.f32.mrb[7].mxu1 }
 0x188   : > { %v1513_v20 = vpack.c.bf16 %v1039_v12, %v1038_v8  ;;  %v1553_v21 = vpack.c.bf16 %v1055_v13, %v1054_v9  ;;  %v969_v22 = vmul.f32 %v1629_v14, %v2398_v51  ;;  %v985_v23 = vmul.f32 %v1677_v15, %v2398_v51 }
 0x189   : > { %v1632_v24 = vadd.f32 %v1631_v18, %v1630_v16  ;;  %v1680_v25 = vadd.f32 %v1679_v19, %v1678_v17 }
 0x18a   : > { %1514 = vst [vmem:[%s2413_s25] sm:$0xff] %v1513_v20   ;;  %1597 = vst [vmem:[%s2413_s25 + $0x40] sm:$0xff] %v1553_v21   ;;  %v1008_v26 = vadd.f32 %v2400_v57, %v969_v22  ;;  %v1024_v27 = vadd.f32 %v2400_v57, %v985_v23 }
 0x18b   : > { %v970_v28 = vmul.f32 %v1632_v24, %v2398_v51  ;;  %v986_v29 = vmul.f32 %v1680_v25, %v2398_v51 }
 0x18c   : > { %v1633_v30 = vpop.f32.mrb[8].mxu0  ;;  %v1681_v31 = vpop.f32.mrb[8].mxu1  ;;  %v1040_v40 = vmax.f32 %v1008_v26, 0.0  ;;  %v1056_v41 = vmax.f32 %v1024_v27, 0.0 }
 0x18d   : > { %v1009_v32 = vadd.f32 %v2400_v57, %v970_v28  ;;  %v1025_v33 = vadd.f32 %v2400_v57, %v986_v29  ;;  %v1634_v34 = vpop.f32.mrb[9].mxu0  ;;  %v1682_v35 = vpop.f32.mrb[9].mxu1 }
 0x18e   : > { %v1635_v36 = vadd.f32 %v1634_v34, %v1633_v30  ;;  %v1683_v37 = vadd.f32 %v1682_v35, %v1681_v31  ;;  %v1636_v38 = vpop.f32.mrb[10].mxu0  ;;  %v1684_v39 = vpop.f32.mrb[10].mxu1 }
 0x18f   : > { %v1041_v42 = vmax.f32 %v1009_v32, 0.0  ;;  %v1057_v43 = vmax.f32 %v1025_v33, 0.0  ;;  %v1637_v44 = vpop.f32.mrb[11].mxu0  ;;  %v1685_v45 = vpop.f32.mrb[11].mxu1 }
 0x190   : > { %v971_v46 = vmul.f32 %v1635_v36, %v2398_v51  ;;  %v987_v47 = vmul.f32 %v1683_v37, %v2398_v51  ;;  %v1638_v48 = vadd.f32 %v1637_v44, %v1636_v38  ;;  %v1686_v49 = vadd.f32 %v1685_v45, %v1684_v39 }
 0x191   : > { %v1518_v50 = vpack.c.bf16 %v1041_v42, %v1040_v40  ;;  %v1558_v52 = vpack.c.bf16 %v1057_v43, %v1056_v41 }
 0x192   : > { %v1010_v53 = vadd.f32 %v2400_v57, %v971_v46  ;;  %v1026_v54 = vadd.f32 %v2400_v57, %v987_v47  ;;  %v972_v55 = vmul.f32 %v1638_v48, %v2398_v51  ;;  %v988_v56 = vmul.f32 %v1686_v49, %v2398_v51 }
 0x193   : > { %1590 = vst [vmem:[%s2413_s25 + $0x8] sm:$0xff] %v1518_v50   ;;  %1598 = vst [vmem:[%s2413_s25 + $0x48] sm:$0xff] %v1558_v52  }
 0x194   : > { %v1011_v58 = vadd.f32 %v2400_v57, %v972_v55  ;;  %v1027_v59 = vadd.f32 %v2400_v57, %v988_v56  ;;  %v1639_v60 = vpop.f32.mrb[12].mxu0  ;;  %v1687_v61 = vpop.f32.mrb[12].mxu1  ;;  %v1042_v62 = vmax.f32 %v1010_v53, 0.0  ;;  %v1058_v63 = vmax.f32 %v1026_v54, 0.0 }
 0x195   : > { %v1640_v0 = vpop.f32.mrb[13].mxu0  ;;  %v1688_v1 = vpop.f32.mrb[13].mxu1 }
 0x196   : > { %v1043_v2 = vmax.f32 %v1011_v58, 0.0  ;;  %v1059_v3 = vmax.f32 %v1027_v59, 0.0  ;;  %v1641_v4 = vadd.f32 %v1640_v0, %v1639_v60  ;;  %v1689_v5 = vadd.f32 %v1688_v1, %v1687_v61  ;;  %v1642_v6 = vpop.f32.mrb[14].mxu0  ;;  %v1690_v7 = vpop.f32.mrb[14].mxu1 }
 0x197   : > { %v1643_v8 = vpop.f32.mrb[15].mxu0  ;;  %v1691_v9 = vpop.f32.mrb[15].mxu1 }
 0x198   : > { %v1523_v10 = vpack.c.bf16 %v1043_v2, %v1042_v62  ;;  %v1563_v11 = vpack.c.bf16 %v1059_v3, %v1058_v63  ;;  %v973_v12 = vmul.f32 %v1641_v4, %v2398_v51  ;;  %v989_v13 = vmul.f32 %v1689_v5, %v2398_v51 }
 0x199   : > { %v1644_v14 = vadd.f32 %v1643_v8, %v1642_v6  ;;  %v1692_v15 = vadd.f32 %v1691_v9, %v1690_v7 }
 0x19a   : > { %1591 = vst [vmem:[%s2413_s25 + $0x10] sm:$0xff] %v1523_v10   ;;  %1599 = vst [vmem:[%s2413_s25 + $0x50] sm:$0xff] %v1563_v11   ;;  %v1012_v16 = vadd.f32 %v2400_v57, %v973_v12  ;;  %v1028_v17 = vadd.f32 %v2400_v57, %v989_v13 }
 0x19b   : > { %v974_v18 = vmul.f32 %v1644_v14, %v2398_v51  ;;  %v990_v19 = vmul.f32 %v1692_v15, %v2398_v51 }
 0x19c   : > { %v1645_v20 = vpop.f32.mrb[16].mxu0  ;;  %v1693_v21 = vpop.f32.mrb[16].mxu1  ;;  %v1044_v30 = vmax.f32 %v1012_v16, 0.0  ;;  %v1060_v31 = vmax.f32 %v1028_v17, 0.0 }
 0x19d   : > { %v1013_v22 = vadd.f32 %v2400_v57, %v974_v18  ;;  %v1029_v23 = vadd.f32 %v2400_v57, %v990_v19  ;;  %v1646_v24 = vpop.f32.mrb[17].mxu0  ;;  %v1694_v25 = vpop.f32.mrb[17].mxu1 }
 0x19e   : > { %v1647_v26 = vadd.f32 %v1646_v24, %v1645_v20  ;;  %v1695_v27 = vadd.f32 %v1694_v25, %v1693_v21  ;;  %v1648_v28 = vpop.f32.mrb[18].mxu0  ;;  %v1696_v29 = vpop.f32.mrb[18].mxu1 }
 0x19f   : > { %v1045_v32 = vmax.f32 %v1013_v22, 0.0  ;;  %v1061_v33 = vmax.f32 %v1029_v23, 0.0  ;;  %v1649_v34 = vpop.f32.mrb[19].mxu0  ;;  %v1697_v35 = vpop.f32.mrb[19].mxu1 }
 0x1a0   : > { %v975_v36 = vmul.f32 %v1647_v26, %v2398_v51  ;;  %v991_v37 = vmul.f32 %v1695_v27, %v2398_v51  ;;  %v1650_v38 = vadd.f32 %v1649_v34, %v1648_v28  ;;  %v1698_v39 = vadd.f32 %v1697_v35, %v1696_v29 }
 0x1a1   : > { %v1528_v40 = vpack.c.bf16 %v1045_v32, %v1044_v30  ;;  %v1568_v41 = vpack.c.bf16 %v1061_v33, %v1060_v31 }
 0x1a2   : > { %v1014_v42 = vadd.f32 %v2400_v57, %v975_v36  ;;  %v1030_v43 = vadd.f32 %v2400_v57, %v991_v37  ;;  %v976_v44 = vmul.f32 %v1650_v38, %v2398_v51  ;;  %v992_v45 = vmul.f32 %v1698_v39, %v2398_v51 }
 0x1a3   : > { %1592 = vst [vmem:[%s2413_s25 + $0x18] sm:$0xff] %v1528_v40   ;;  %1600 = vst [vmem:[%s2413_s25 + $0x58] sm:$0xff] %v1568_v41  }
 0x1a4   : > { %v1015_v46 = vadd.f32 %v2400_v57, %v976_v44  ;;  %v1031_v47 = vadd.f32 %v2400_v57, %v992_v45  ;;  %v1651_v48 = vpop.f32.mrb[20].mxu0  ;;  %v1699_v49 = vpop.f32.mrb[20].mxu1  ;;  %v1046_v50 = vmax.f32 %v1014_v42, 0.0  ;;  %v1062_v52 = vmax.f32 %v1030_v43, 0.0 }
 0x1a5   : > { %v1652_v53 = vpop.f32.mrb[21].mxu0  ;;  %v1700_v54 = vpop.f32.mrb[21].mxu1 }
 0x1a6   : > { %v1047_v55 = vmax.f32 %v1015_v46, 0.0  ;;  %v1063_v56 = vmax.f32 %v1031_v47, 0.0  ;;  %v1653_v58 = vadd.f32 %v1652_v53, %v1651_v48  ;;  %v1701_v59 = vadd.f32 %v1700_v54, %v1699_v49  ;;  %v1654_v60 = vpop.f32.mrb[22].mxu0  ;;  %v1702_v61 = vpop.f32.mrb[22].mxu1 }
 0x1a7   : > { %v1655_v62 = vpop.f32.mrb[23].mxu0  ;;  %v1703_v63 = vpop.f32.mrb[23].mxu1 }
 0x1a8   : > { %v1533_v0 = vpack.c.bf16 %v1047_v55, %v1046_v50  ;;  %v1573_v1 = vpack.c.bf16 %v1063_v56, %v1062_v52  ;;  %v977_v2 = vmul.f32 %v1653_v58, %v2398_v51  ;;  %v993_v3 = vmul.f32 %v1701_v59, %v2398_v51 }
 0x1a9   : > { %v1656_v4 = vadd.f32 %v1655_v62, %v1654_v60  ;;  %v1704_v5 = vadd.f32 %v1703_v63, %v1702_v61 }
 0x1aa   : > { %1593 = vst [vmem:[%s2413_s25 + $0x20] sm:$0xff] %v1533_v0   ;;  %1601 = vst [vmem:[%s2413_s25 + $0x60] sm:$0xff] %v1573_v1   ;;  %v1016_v6 = vadd.f32 %v2400_v57, %v977_v2  ;;  %v1032_v7 = vadd.f32 %v2400_v57, %v993_v3 }
 0x1ab   : > { %v978_v8 = vmul.f32 %v1656_v4, %v2398_v51  ;;  %v994_v9 = vmul.f32 %v1704_v5, %v2398_v51 }
 0x1ac   : > { %v1657_v10 = vpop.f32.mrb[24].mxu0  ;;  %v1705_v11 = vpop.f32.mrb[24].mxu1  ;;  %v1048_v20 = vmax.f32 %v1016_v6, 0.0  ;;  %v1064_v21 = vmax.f32 %v1032_v7, 0.0 }
 0x1ad   : > { %v1017_v12 = vadd.f32 %v2400_v57, %v978_v8  ;;  %v1033_v13 = vadd.f32 %v2400_v57, %v994_v9  ;;  %v1658_v14 = vpop.f32.mrb[25].mxu0  ;;  %v1706_v15 = vpop.f32.mrb[25].mxu1 }
 0x1ae   : > { %v1659_v16 = vadd.f32 %v1658_v14, %v1657_v10  ;;  %v1707_v17 = vadd.f32 %v1706_v15, %v1705_v11  ;;  %v1660_v18 = vpop.f32.mrb[26].mxu0  ;;  %v1708_v19 = vpop.f32.mrb[26].mxu1 }
 0x1af   : > { %v1049_v22 = vmax.f32 %v1017_v12, 0.0  ;;  %v1065_v23 = vmax.f32 %v1033_v13, 0.0  ;;  %v1661_v24 = vpop.f32.mrb[27].mxu0  ;;  %v1709_v25 = vpop.f32.mrb[27].mxu1 }
 0x1b0   : > { %v979_v26 = vmul.f32 %v1659_v16, %v2398_v51  ;;  %v995_v27 = vmul.f32 %v1707_v17, %v2398_v51  ;;  %v1662_v28 = vadd.f32 %v1661_v24, %v1660_v18  ;;  %v1710_v29 = vadd.f32 %v1709_v25, %v1708_v19 }
 0x1b1   : > { %v1538_v30 = vpack.c.bf16 %v1049_v22, %v1048_v20  ;;  %v1578_v31 = vpack.c.bf16 %v1065_v23, %v1064_v21 }
 0x1b2   : > { %v1018_v32 = vadd.f32 %v2400_v57, %v979_v26  ;;  %v1034_v33 = vadd.f32 %v2400_v57, %v995_v27  ;;  %v980_v34 = vmul.f32 %v1662_v28, %v2398_v51  ;;  %v996_v35 = vmul.f32 %v1710_v29, %v2398_v51 }
 0x1b3   : > { %1594 = vst [vmem:[%s2413_s25 + $0x28] sm:$0xff] %v1538_v30   ;;  %1602 = vst [vmem:[%s2413_s25 + $0x68] sm:$0xff] %v1578_v31  }
 0x1b4   : > { %v1019_v36 = vadd.f32 %v2400_v57, %v980_v34  ;;  %v1035_v37 = vadd.f32 %v2400_v57, %v996_v35  ;;  %v1663_v38 = vpop.f32.mrb[28].mxu0  ;;  %v1711_v39 = vpop.f32.mrb[28].mxu1  ;;  %v1050_v40 = vmax.f32 %v1018_v32, 0.0  ;;  %v1066_v41 = vmax.f32 %v1034_v33, 0.0 }
 0x1b5   : > { %v1664_v42 = vpop.f32.mrb[29].mxu0  ;;  %v1712_v43 = vpop.f32.mrb[29].mxu1 }
 0x1b6   : > { %v1051_v44 = vmax.f32 %v1019_v36, 0.0  ;;  %v1067_v45 = vmax.f32 %v1035_v37, 0.0  ;;  %v1665_v46 = vadd.f32 %v1664_v42, %v1663_v38  ;;  %v1713_v47 = vadd.f32 %v1712_v43, %v1711_v39  ;;  %v1666_v48 = vpop.f32.mrb[30].mxu0  ;;  %v1714_v49 = vpop.f32.mrb[30].mxu1 }
 0x1b7   : > { %v1667_v50 = vpop.f32.mrb[31].mxu0  ;;  %v1715_v52 = vpop.f32.mrb[31].mxu1 }
 0x1b8   : > { %v1543_v53 = vpack.c.bf16 %v1051_v44, %v1050_v40  ;;  %v1583_v54 = vpack.c.bf16 %v1067_v45, %v1066_v41  ;;  %v981_v55 = vmul.f32 %v1665_v46, %v2398_v51  ;;  %v997_v56 = vmul.f32 %v1713_v47, %v2398_v51 }
 0x1b9   : > { %v1668_v58 = vadd.f32 %v1667_v50, %v1666_v48  ;;  %v1716_v59 = vadd.f32 %v1715_v52, %v1714_v49 }
 0x1ba   : > { %1595 = vst [vmem:[%s2413_s25 + $0x30] sm:$0xff] %v1543_v53   ;;  %1603 = vst [vmem:[%s2413_s25 + $0x70] sm:$0xff] %v1583_v54   ;;  %v1020_v60 = vadd.f32 %v2400_v57, %v981_v55  ;;  %v1036_v61 = vadd.f32 %v2400_v57, %v997_v56 }
 0x1bb   : > { %v982_v62 = vmul.f32 %v1668_v58, %v2398_v51  ;;  %v998_v63 = vmul.f32 %v1716_v59, %v2398_v51 }
 0x1bc   : > { %v1052_v2 = vmax.f32 %v1020_v60, 0.0  ;;  %v1068_v3 = vmax.f32 %v1036_v61, 0.0 }
 0x1bd   : > { %v1021_v0 = vadd.f32 %v2400_v57, %v982_v62  ;;  %v1037_v1 = vadd.f32 %v2400_v57, %v998_v63 }
 0x1bf   : > { %v1053_v4 = vmax.f32 %v1021_v0, 0.0  ;;  %v1069_v5 = vmax.f32 %v1037_v1, 0.0 }
 0x1c1   : > { %v1548_v51 = vpack.c.bf16 %v1053_v4, %v1052_v2  ;;  %v1588_v6 = vpack.c.bf16 %v1069_v5, %v1068_v3 }
 0x1c3   : > { %1596 = vst [vmem:[%s2413_s25 + $0x38] sm:$0xff] %v1548_v51   ;;  %1604 = vst [vmem:[%s2413_s25 + $0x78] sm:$0xff] %v1588_v6  }
 0x1c4   : > { %2023 = shalt.err (!%p2020_p0)
}
 0x1c5   : > { %s2024_s29 = scalar_lea.hbm %s2488_s6, 2048  ;;  %s2028_s8 = scalar_lea.hbm %s2545_s4, 4096 }
 0x1c6   : > { %p2025_p4 = scmp.ne.s32.totalorder %s2488_s6, %s2024_s29  ;;  %p2029_p12 = scmp.lt.u32.totalorder %s2488_s6, %s2545_s4 }
 0x1c7   : > { %p2030_p1 = scmp.lt.u32.totalorder %s2028_s8, %s2024_s29  ;;  %p2032_p13 = scmp.lt.u32.totalorder %s2024_s29, %s2488_s6 }
 0x1c8   : > { %p2026_p2 = pnand %p2025_p4, %p2290_p10 }
 0x1c9   : > { %p2031_p11 = por %p2030_p1, %p2029_p12 }
 0x1ca   : > { %p2027_p8 = pneg %p2026_p2 }
 0x1cb   : > { %p2033_p6 = por %p2032_p13, %p2031_p11 }
 0x1cd   : > { %p2034_p3 = pnand %p2033_p6, %p2027_p8 }
 0x1cf   : > { %2037 = shalt.err (!%p2034_p3)
}
 0x1d0   : > { %s2111_s25 = smov 64   ;;  %s2112_s27 = smov 4  }
 0x1d1   : > { %1747 = dma.vmem_to_hbm [thread:$0]  (%p2290_p10), %s2490_s24, 2048, %s2488_s6, %s1231_s18, %s2111_s25, %s2111_s25, %s2112_s27  }
 0x1d2 PF: > { %s2565_s22 = sld [smem:[#allocation16_spill]]  ;;  %s1260_s28 = sand.u32 1, %s2080_s15  }
 0x1d3   : > { %p2567_p7 = scmp.ge.s32.totalorder %s2100_s20, 2  ;;  %s1261_s7 = scalar_lea.sflag [#allocation5], %s1260_s28 }
 0x1d8   : > { %p2566_p5 = scmp.ne.s32.totalorder %s2565_s22, 0 }
 0x1da   : > { %p1764_p9 = pnand %p2567_p7, %p2566_p5 }
 0x1dc   : > { %2075 = dma.done.wait (!%p1764_p9), %s1261_s7, 2048  }
 0x1dd   : > { %2077 = vsyncadd (!%p1764_p9), %s1261_s7, 4294965248  ;;  %s22_s20 = sadd.s32 1, %s2100_s20   ;;  %s2568_s15 = smov %s2084_s16 }
 0x1de   : > { %p19_p0 = scmp.ge.s32.totalorder %s22_s20, 4   ;;  %s2569_s16 = smov %s2088_s17 }
 0x1df   : > { %s2570_s17 = smov %s2302_s11  ;;  %s2571_s18 = smov %s2096_s19 }
 0x1e0   : > { %s2572_s19 = smov %s2574_s26  ;;  %21 = sbr.rel (!%p19_p0) target bundleno = 8 (0x8), region = 104 }
 0x1e7   :  { %1266 = vsyncpa [#allocation4], 1 }
 0x1e8   :  { %1268 = vsyncpa [#allocation4 + $0x1], 1 }
 0x1e9   :  { %1269 = vsyncpa [#allocation7], 1 }
 0x1ea   :  { %1270 = vsyncpa [#allocation10], 1 }
 0x1eb   :  { %1271 = vsyncpa [#allocation5], 1 }
 0x1ec   :  { %1273 = vsyncpa [#allocation5 + $0x1], 1 }

</bundles_post_ra>
